<compile_context>
chip_gen: v6e
topology: v6e:2x2x1
jax: 0.10.0
libtpu: 0.0.40
codegen_flags: <defaults>
</compile_context>

<pallas_src>
import functools

import jax
import jax.numpy as jnp
from jax.experimental import pallas as pl
from jax.experimental.pallas import tpu as pltpu

D_IN = 28 * 28      # 784
D_H1 = 512
D_H2 = 128
D_OUT = 10
D_OUT_PAD = 128     # lane-dense logits; real classes live in lanes [:10]
NEG_BIG = -1e30     # bias for padded logit lanes (never wins max, exp -> 0)


def _round_up(x, m):
    return (x + m - 1) // m * m


def mlp_kernel(x_ref, w1_ref, b1_ref, w2_ref, b2_ref, w3_ref, b3_ref, o_ref):
    # x tile arrives as raw f32 from HBM; cast to bf16 here (VPU work hidden
    # under the MXU) instead of a separate XLA pad/convert pass.
    x = x_ref[...].astype(jnp.bfloat16)

    # fc1 + relu (MXU bf16 matmul, f32 accumulate)
    h1 = jnp.dot(x, w1_ref[...], preferred_element_type=jnp.float32) + b1_ref[...]
    h1 = jnp.maximum(h1, 0.0).astype(jnp.bfloat16)

    # fc2 + relu
    h2 = jnp.dot(h1, w2_ref[...], preferred_element_type=jnp.float32) + b2_ref[...]
    h2 = jnp.maximum(h2, 0.0).astype(jnp.bfloat16)

    # fc3 on a full 128-wide tile. Padded lanes carry bias -1e30: they never
    # win the row max and exp() underflows to 0 in the LSE, so real log-probs
    # are identical to the unpadded computation.
    logits = jnp.dot(h2, w3_ref[...], preferred_element_type=jnp.float32) + b3_ref[...]

    # numerically stable log_softmax over the last axis (f32)
    m = jnp.max(logits, axis=-1, keepdims=True)
    shifted = logits - m
    lse = jnp.log(jnp.sum(jnp.exp(shifted), axis=-1, keepdims=True))
    o_ref[...] = (shifted - lse).astype(o_ref.dtype)


def init_params(key):
    """Synthetic Net parameters, stored as (in_features, out_features) = W.T."""
    k1, k2, k3, k4, k5, k6 = jax.random.split(key, 6)
    w1 = jax.random.normal(k1, (D_IN, D_H1), jnp.float32) * 0.02
    b1 = jax.random.normal(k2, (1, D_H1), jnp.float32) * 0.02
    w2 = jax.random.normal(k3, (D_H1, D_H2), jnp.float32) * 0.02
    b2 = jax.random.normal(k4, (1, D_H2), jnp.float32) * 0.02
    w3 = jax.random.normal(k5, (D_H2, D_OUT), jnp.float32) * 0.02
    b3 = jax.random.normal(k6, (1, D_OUT), jnp.float32) * 0.02
    return (w1, b1, w2, b2, w3, b3)


def prepare_params(raw_params):
    """Cast raw f32 (in,out)-layout params into the kernel's layout:
    bf16 weights (w1 kept at its natural 784 rows, logits padded to 128 lanes),
    f32 biases (padded logit lanes get -1e30)."""
    w1, b1, w2, b2, w3, b3 = raw_params
    w1p = w1.astype(jnp.bfloat16)                      # (784, 512)
    w2p = w2.astype(jnp.bfloat16)                      # (512, 128)
    w3p = (jnp.zeros((D_H2, D_OUT_PAD), jnp.float32)
           .at[:, :D_OUT].set(w3).astype(jnp.bfloat16))
    b1p = b1.reshape(1, D_H1).astype(jnp.float32)
    b2p = b2.reshape(1, D_H2).astype(jnp.float32)
    b3p = (jnp.full((1, D_OUT_PAD), NEG_BIG, jnp.float32)
           .at[:, :D_OUT].set(b3.reshape(1, D_OUT)))
    return (w1p, b1p, w2p, b2p, w3p, b3p)


@functools.partial(jax.jit, static_argnames=("tm",))
def net_forward(x_nchw, kparams, tm=512):
    """x_nchw: (N, 1, 28, 28) f32 -> (N, 10) f32 log-probs."""
    w1p, b1p, w2p, b2p, w3p, b3p = kparams
    n = x_nchw.shape[0]

    # flatten like torch's x.view(bs, -1); stays f32, no pad/cast pre-pass
    x = x_nchw.reshape(n, D_IN)

    # Batch tile: as large as requested but capped so the grid has >= 2 steps,
    # which lets ("parallel",) shard the batch across both v7x TensorCores.
    half = _round_up(max(pl.cdiv(n, 2), 1), 8)
    tm_eff = max(8, min(tm, half))
    n_pad = _round_up(max(n, 2 * tm_eff), tm_eff)
    if n_pad != n:
        x = jnp.pad(x, ((0, n_pad - n), (0, 0)))
    grid = (n_pad // tm_eff,)

    # Explicit scoped-VMEM budget: double-buffered f32 x / out tiles,
    # single-buffered bf16 weights, plus intermediate activations; 1.5x slack.
    weights_bytes = ((D_IN * D_H1 + D_H1 * D_H2 + D_H2 * D_OUT_PAD) * 2
                     + (D_H1 + D_H2 + D_OUT_PAD) * 4)
    io_bytes = 2 * tm_eff * (D_IN + D_OUT_PAD) * 4
    temp_bytes = tm_eff * (D_IN * 2 + D_H1 * 6 + D_H2 * 6 + D_OUT_PAD * 12)
    vmem_limit = int(min(max((weights_bytes + io_bytes + temp_bytes) * 3 // 2,
                             32 << 20), 56 << 20))

    flops = 2 * n_pad * (D_IN * D_H1 + D_H1 * D_H2 + D_H2 * D_OUT_PAD)
    bytes_accessed = (
        n_pad * D_IN * 4                                              # x (f32)
        + (D_IN * D_H1 + D_H1 * D_H2 + D_H2 * D_OUT_PAD) * 2          # weights (bf16)
        + (D_H1 + D_H2 + D_OUT_PAD) * 4                               # biases (f32)
        + n_pad * D_OUT_PAD * 4                                       # out (f32)
    )

    resident = dict(pipeline_mode=pl.Buffered(1))  # fetched once, single buffer

    out = pl.pallas_call(
        mlp_kernel,
        out_shape=jax.ShapeDtypeStruct((n_pad, D_OUT_PAD), jnp.float32),
        grid=grid,
        in_specs=[
            pl.BlockSpec((tm_eff, D_IN), lambda i: (i, 0)),                 # x: f32, batch-tiled
            pl.BlockSpec((D_IN, D_H1), lambda i: (0, 0), **resident),       # w1 (VMEM-resident)
            pl.BlockSpec((1, D_H1), lambda i: (0, 0), **resident),          # b1
            pl.BlockSpec((D_H1, D_H2), lambda i: (0, 0), **resident),       # w2
            pl.BlockSpec((1, D_H2), lambda i: (0, 0), **resident),          # b2
            pl.BlockSpec((D_H2, D_OUT_PAD), lambda i: (0, 0), **resident),  # w3 (lane-padded)
            pl.BlockSpec((1, D_OUT_PAD), lambda i: (0, 0), **resident),     # b3 (lane-padded)
        ],
        out_specs=pl.BlockSpec((tm_eff, D_OUT_PAD), lambda i: (i, 0)),
        compiler_params=pltpu.CompilerParams(
            dimension_semantics=("parallel",),   # megacore-shard the batch axis
            vmem_limit_bytes=vmem_limit,
        ),
        cost_estimate=pl.CostEstimate(
            flops=flops,
            transcendentals=n_pad * D_OUT_PAD,
            bytes_accessed=bytes_accessed,
        ),
    )(x, w1p, b1p, w2p, b2p, w3p, b3p)

    return out[:n, :D_OUT]


def reference_forward(x_nchw, raw_params):
    """Pure-JAX f32 reference matching the PyTorch Net forward."""
    w1, b1, w2, b2, w3, b3 = raw_params
    n = x_nchw.shape[0]
    x = x_nchw.reshape(n, -1)
    h1 = jnp.maximum(x @ w1 + b1, 0.0)
    h2 = jnp.maximum(h1 @ w2 + b2, 0.0)
    logits = h2 @ w3 + b3
    return jax.nn.log_softmax(logits, axis=-1)


if __name__ == "__main__":
    key = jax.random.PRNGKey(0)
    kx, kp = jax.random.split(key)

    batch = 2
    x = jax.random.normal(kx, (batch, 1, 28, 28), jnp.float32)  # NCHW like PyTorch MNIST
    raw_params = init_params(kp)
    kparams = prepare_params(raw_params)

    out = net_forward(x, kparams)
    out = jax.block_until_ready(out)

    # Sanity: shape, log_softmax rows sum to ~1 in prob space, and close to the
    # f32 reference (bf16-activation accuracy, ~1e-2-level deviation expected).
    assert out.shape == (batch, 10)
    row_sums = jnp.sum(jnp.exp(out), axis=-1)
    assert jnp.allclose(row_sums, jnp.ones_like(row_sums), atol=1e-4)

    ref = reference_forward(x, raw_params)
    assert jnp.allclose(out, ref, atol=1e-1), float(jnp.max(jnp.abs(out - ref)))

    print("KERNEL_OK")
</pallas_src>

<mosaic_0001>
module attributes {stable_mosaic.version = 11 : i64} {
  func.func @mlp_kernel(%arg0: i32, %arg1: memref<8x784xf32, #tpu.memory_space<vmem>>, %arg2: memref<784x512xbf16, #tpu.memory_space<vmem>>, %arg3: memref<1x512xf32, #tpu.memory_space<vmem>>, %arg4: memref<512x128xbf16, #tpu.memory_space<vmem>>, %arg5: memref<1x128xf32, #tpu.memory_space<vmem>>, %arg6: memref<128x128xbf16, #tpu.memory_space<vmem>>, %arg7: memref<1x128xf32, #tpu.memory_space<vmem>>, %arg8: memref<8x128xf32, #tpu.memory_space<vmem>>) attributes {dimension_semantics = [#tpu.dimension_semantics<parallel>], iteration_bounds = array<i64: 2>, scalar_prefetch = 0 : i64, scratch_operands = 0 : i64, tpu.core_type = #tpu.core_type<tc>, window_params = [{transform_indices = @transform_0, window_bounds = array<i64: 8, 784>}, {pipeline_mode = #tpu.pipeline_mode<synchronous>, transform_indices = @transform_1, window_bounds = array<i64: 784, 512>}, {pipeline_mode = #tpu.pipeline_mode<synchronous>, transform_indices = @transform_2, window_bounds = array<i64: 1, 512>}, {pipeline_mode = #tpu.pipeline_mode<synchronous>, transform_indices = @transform_3, window_bounds = array<i64: 512, 128>}, {pipeline_mode = #tpu.pipeline_mode<synchronous>, transform_indices = @transform_4, window_bounds = array<i64: 1, 128>}, {pipeline_mode = #tpu.pipeline_mode<synchronous>, transform_indices = @transform_5, window_bounds = array<i64: 128, 128>}, {pipeline_mode = #tpu.pipeline_mode<synchronous>, transform_indices = @transform_6, window_bounds = array<i64: 1, 128>}, {transform_indices = @transform_7, window_bounds = array<i64: 8, 128>}]} {
    %c0 = arith.constant 0 : index
    %c0_0 = arith.constant 0 : index
    %0 = vector.load %arg1[%c0, %c0_0] : memref<8x784xf32, #tpu.memory_space<vmem>>, vector<8x784xf32>
    %1 = arith.truncf %0 : vector<8x784xf32> to vector<8x784xbf16>
    %c0_1 = arith.constant 0 : index
    %c0_2 = arith.constant 0 : index
    %2 = vector.load %arg2[%c0_1, %c0_2] : memref<784x512xbf16, #tpu.memory_space<vmem>>, vector<784x512xbf16>
    %cst = arith.constant dense<0.000000e+00> : vector<8x512xf32>
    %3 = tpu.matmul %1, %2, %cst {dimension_numbers = #tpu.dot_dimension_numbers<[1], [0], [0], [1], [0, 0, 1, 1], [], []>} : vector<8x784xbf16>, vector<784x512xbf16>, vector<8x512xf32> -> vector<8x512xf32>
    %c0_3 = arith.constant 0 : index
    %c0_4 = arith.constant 0 : index
    %4 = vector.load %arg3[%c0_3, %c0_4] : memref<1x512xf32, #tpu.memory_space<vmem>>, vector<1x512xf32>
    %5 = vector.broadcast %4 : vector<1x512xf32> to vector<8x512xf32>
    %6 = arith.addf %3, %5 : vector<8x512xf32>
    %cst_5 = arith.constant 0.000000e+00 : f32
    %7 = vector.broadcast %cst_5 : f32 to vector<8x512xf32>
    %8 = arith.maximumf %6, %7 : vector<8x512xf32>
    %9 = arith.truncf %8 : vector<8x512xf32> to vector<8x512xbf16>
    %c0_6 = arith.constant 0 : index
    %c0_7 = arith.constant 0 : index
    %10 = vector.load %arg4[%c0_6, %c0_7] : memref<512x128xbf16, #tpu.memory_space<vmem>>, vector<512x128xbf16>
    %cst_8 = arith.constant dense<0.000000e+00> : vector<8x128xf32>
    %11 = tpu.matmul %9, %10, %cst_8 {dimension_numbers = #tpu.dot_dimension_numbers<[1], [0], [0], [1], [0, 0, 1, 1], [], []>} : vector<8x512xbf16>, vector<512x128xbf16>, vector<8x128xf32> -> vector<8x128xf32>
    %c0_9 = arith.constant 0 : index
    %c0_10 = arith.constant 0 : index
    %12 = vector.load %arg5[%c0_9, %c0_10] : memref<1x128xf32, #tpu.memory_space<vmem>>, vector<1x128xf32>
    %13 = vector.broadcast %12 : vector<1x128xf32> to vector<8x128xf32>
    %14 = arith.addf %11, %13 : vector<8x128xf32>
    %cst_11 = arith.constant 0.000000e+00 : f32
    %15 = vector.broadcast %cst_11 : f32 to vector<8x128xf32>
    %16 = arith.maximumf %14, %15 : vector<8x128xf32>
    %17 = arith.truncf %16 : vector<8x128xf32> to vector<8x128xbf16>
    %c0_12 = arith.constant 0 : index
    %c0_13 = arith.constant 0 : index
    %18 = vector.load %arg6[%c0_12, %c0_13] : memref<128x128xbf16, #tpu.memory_space<vmem>>, vector<128x128xbf16>
    %cst_14 = arith.constant dense<0.000000e+00> : vector<8x128xf32>
    %19 = tpu.matmul %17, %18, %cst_14 {dimension_numbers = #tpu.dot_dimension_numbers<[1], [0], [0], [1], [0, 0, 1, 1], [], []>} : vector<8x128xbf16>, vector<128x128xbf16>, vector<8x128xf32> -> vector<8x128xf32>
    %c0_15 = arith.constant 0 : index
    %c0_16 = arith.constant 0 : index
    %20 = vector.load %arg7[%c0_15, %c0_16] : memref<1x128xf32, #tpu.memory_space<vmem>>, vector<1x128xf32>
    %21 = vector.broadcast %20 : vector<1x128xf32> to vector<8x128xf32>
    %22 = arith.addf %19, %21 : vector<8x128xf32>
    %cst_17 = arith.constant dense<0xFF800000> : vector<8xf32>
    %23 = vector.multi_reduction <maximumf>, %22, %cst_17 [1] : vector<8x128xf32> to vector<8xf32>
    %24 = vector.shape_cast %23 : vector<8xf32> to vector<8x1xf32>
    %25 = vector.broadcast %24 : vector<8x1xf32> to vector<8x128xf32>
    %26 = arith.subf %22, %25 : vector<8x128xf32>
    %27 = math.exp %26 : vector<8x128xf32>
    %cst_18 = arith.constant dense<0.000000e+00> : vector<8xf32>
    %28 = vector.multi_reduction <add>, %27, %cst_18 [1] : vector<8x128xf32> to vector<8xf32>
    %29 = vector.shape_cast %28 : vector<8xf32> to vector<8x1xf32>
    %30 = math.log %29 : vector<8x1xf32>
    %31 = vector.broadcast %30 : vector<8x1xf32> to vector<8x128xf32>
    %32 = arith.subf %26, %31 : vector<8x128xf32>
    %c0_19 = arith.constant 0 : index
    %c0_20 = arith.constant 0 : index
    %33 = vector.load %arg8[%c0_19, %c0_20] : memref<8x128xf32, #tpu.memory_space<vmem>>, vector<8x128xf32>
    tpu.vector_store %arg8[%c0_19, %c0_20], %32 {strides = array<i32>} : memref<8x128xf32, #tpu.memory_space<vmem>>, vector<8x128xf32>,
    return
  }
  func.func @transform_0(%arg0: i32) -> (i32, i32) {
    %c0_i32 = arith.constant 0 : i32
    %c0_i32_0 = arith.constant 0 : i32
    return %arg0, %c0_i32 : i32, i32
  }
  func.func @transform_1(%arg0: i32) -> (i32, i32) {
    %c0_i32 = arith.constant 0 : i32
    %c0_i32_0 = arith.constant 0 : i32
    %c0_i32_1 = arith.constant 0 : i32
    return %c0_i32, %c0_i32_0 : i32, i32
  }
  func.func @transform_2(%arg0: i32) -> (i32, i32) {
    %c0_i32 = arith.constant 0 : i32
    %c0_i32_0 = arith.constant 0 : i32
    %c0_i32_1 = arith.constant 0 : i32
    return %c0_i32, %c0_i32_0 : i32, i32
  }
  func.func @transform_3(%arg0: i32) -> (i32, i32) {
    %c0_i32 = arith.constant 0 : i32
    %c0_i32_0 = arith.constant 0 : i32
    %c0_i32_1 = arith.constant 0 : i32
    return %c0_i32, %c0_i32_0 : i32, i32
  }
  func.func @transform_4(%arg0: i32) -> (i32, i32) {
    %c0_i32 = arith.constant 0 : i32
    %c0_i32_0 = arith.constant 0 : i32
    %c0_i32_1 = arith.constant 0 : i32
    return %c0_i32, %c0_i32_0 : i32, i32
  }
  func.func @transform_5(%arg0: i32) -> (i32, i32) {
    %c0_i32 = arith.constant 0 : i32
    %c0_i32_0 = arith.constant 0 : i32
    %c0_i32_1 = arith.constant 0 : i32
    return %c0_i32, %c0_i32_0 : i32, i32
  }
  func.func @transform_6(%arg0: i32) -> (i32, i32) {
    %c0_i32 = arith.constant 0 : i32
    %c0_i32_0 = arith.constant 0 : i32
    %c0_i32_1 = arith.constant 0 : i32
    return %c0_i32, %c0_i32_0 : i32, i32
  }
  func.func @transform_7(%arg0: i32) -> (i32, i32) {
    %c0_i32 = arith.constant 0 : i32
    %c0_i32_0 = arith.constant 0 : i32
    return %arg0, %c0_i32 : i32, i32
  }
}

</mosaic_0001>

<bundles_post_ra>
// kernel: net_forward.1
= control target key start
LH: loop header
LB: loop body
LE: loop exit
PB: predicated region body
PF: predicated region fallthrough
CT: control target
= control target key end

     0   :  { %12 = vsyncpa [#allocation3], 0  ;;  %s3148_s24 = smov 0   ;;  %s3361_s0 = inlined_call_operand.vmem [shape: f32[16,784], index: 0, kind: input, shape index: {}]   ;;  %s3362_s1 = inlined_call_operand.hbm [shape: bf16[784,512], index: 1, kind: input, shape index: {}]   ;;  %s3363_s2 = inlined_call_operand.vmem [shape: f32[1,512], index: 2, kind: input, shape index: {}]   ;;  %s3364_s3 = inlined_call_operand.vmem [shape: bf16[512,128], index: 3, kind: input, shape index: {}]   ;;  %s3365_s4 = inlined_call_operand.vmem [shape: f32[1,128], index: 4, kind: input, shape index: {}]   ;;  %s3366_s5 = inlined_call_operand.vmem [shape: bf16[128,128], index: 5, kind: input, shape index: {}]   ;;  %s3367_s6 = inlined_call_operand.vmem [shape: f32[1,128], index: 6, kind: input, shape index: {}]   ;;  %s3368_s7 = inlined_call_operand.vmem [shape: f32[16,128], index: 7, kind: output, shape index: {}]  }
   0x1 LB: > { %s3154_s25 = sadd.s32 4294967295, %s3100_s24   ;;  %p2379_p0 = scmp.ge.s32.totalorder %s3100_s24, 1  ;;  %s3100_s24 = sphi %s3148_s24, %s18_s24  }
   0x2   : > { %p201_p1 = scmp.lt.s32.totalorder %s3100_s24, 3  ;;  %s3102_s26 = smov [#allocation2]  }
   0x3   : > { %s213_s27 = sshll.u32 %s3102_s26, 4  ;;  %p2710_p3 = scmp.eq.s32.totalorder %s3154_s25, 0  ;;  %s214_s27 = int_to_ptr.vmem [resolvable:$true] %s213_s27 }
   0x4   : > { %p3158_p2 = pnand %p2379_p0, %p201_p1  ;;  %s3075_s29 = scalar_lea.vmem %s214_s27, 25088 }
   0x5   : > { %p3076_p7 = scmp.ne.s32.totalorder %s214_s27, %s3075_s29  ;;  %p3083_p10 = scmp.lt.s32.totalorder %s214_s27, %s214_s27 }
   0x6   : > { %p2706_p4 = pneg %p3158_p2  ;;  %p3084_p11 = scmp.lt.s32.totalorder %s3075_s29, %s3075_s29 }
   0x8   : > { %p2707_p5 = pnand %p2710_p3, %p2706_p4  ;;  %p3085_p12 = por %p3084_p11, %p3083_p10 }
   0xa   : > { %p3066_p6 = pneg %p2707_p5 }
   0xc   : > { %p3078_p8 = pnand %p3076_p7, %p3066_p6 }
   0xe   : > { %p3079_p9 = pneg %p3078_p8 }
  0x10   : > { %p3086_p13 = pnand %p3085_p12, %p3079_p9 }
  0x12   : > { %3089 = shalt.err (!%p3086_p13)
}
  0x13   : > { %s3103_s30 = smov 256   ;;  %s3104_s8 = smov 16  }
  0x14   : > { %2709 = dma.hbm_to_vmem [thread:$0]  (!%p2707_p5), %s3362_s1, 25088, %s214_s27, [#allocation3], %s3103_s30, %s3103_s30, %s3104_s8  }
  0x15   : > { %252 = sbr.rel (%p3158_p2) target bundleno = 1150 (0x47e), region = 48 }
  0x1a   : > { %3095 = dma.done.wait (%p2710_p3), [#allocation3], 25088  }
  0x1b   : > { %3097 = vsyncadd (%p2710_p3), [#allocation3], 4294942208  ;;  %v2726_v0 = vld [vmem:[#allocation2 + $0xe4] ss:$16 sps:$4 sm:$0xff]   ;;  %v2730_v2 = vld [vmem:[#allocation2 + $0xe0] ss:$16 sps:$4 sm:$0xff]  }
  0x1c   : > { %v2728_v1 = vld [vmem:[#allocation2 + $0x2e4] ss:$16 sps:$4 sm:$0xff]   ;;  %1509 = vmatprep.subr.bf16.mxu0 %v2726_v0  ;;  %v2731_v3 = vld [vmem:[#allocation2 + $0x2e0] ss:$16 sps:$4 sm:$0xff]   ;;  %p283_p0 = scmp.lt.s32.totalorder %s3154_s25, 1  ;;  %vm1505_vm0 = vcmask 130048  }
  0x1d   : > { %1550 = vmatprep.subr.bf16.mxu1 %v2728_v1  ;;  %v2732_v4 = vld [vmem:[#allocation2 + $0xc4] ss:$16 sps:$4 sm:$0xff]   ;;  %1510 = vmatpush1.bf16.msra.mxu0 %v2730_v2  ;;  %v2736_v6 = vld [vmem:[#allocation2 + $0xc0] ss:$16 sps:$4 sm:$0xff]   ;;  %vm3107_vm1 = vmmov 0  }
  0x1e   : > { %1551 = vmatpush1.bf16.msra.mxu1 %v2731_v3  ;;  %v2734_v5 = vld [vmem:[#allocation2 + $0x2c4] ss:$16 sps:$4 sm:$0xff]   ;;  %1511 = vmatprep.subr.bf16.mxu0 %v2732_v4  ;;  %v2737_v7 = vld [vmem:[#allocation2 + $0x2c0] ss:$16 sps:$4 sm:$0xff]   ;;  %s3371_s25 = smov (!%p283_p0, %s3154_s25), 1 }
  0x1f   : > { %1552 = vmatprep.subr.bf16.mxu1 %v2734_v5  ;;  %v2738_v8 = vld [vmem:[#allocation2 + $0xa4] ss:$16 sps:$4 sm:$0xff]   ;;  %v2742_v10 = vld [vmem:[#allocation2 + $0xa0] ss:$16 sps:$4 sm:$0xff]   ;;  %s2701_s11 = smul.u32 56, %s3371_s25  ;;  %s2385_s17 = sshll.u32 %s3371_s25, 3 }
  0x20   : > { %v2740_v9 = vld [vmem:[#allocation2 + $0x2a4] ss:$16 sps:$4 sm:$0xff]   ;;  %v2743_v11 = vld [vmem:[#allocation2 + $0x2a0] ss:$16 sps:$4 sm:$0xff]   ;;  %s291_s20 = scalar_lea.vmem %s3368_s7, %s2385_s17 }
  0x21   : > { %1512 = vmatpush1.bf16.msra.mxu0 %v2736_v6  ;;  %v2744_v12 = vld [vmem:[#allocation2 + $0x84] ss:$16 sps:$4 sm:$0xff]   ;;  %v2748_v14 = vld [vmem:[#allocation2 + $0x80] ss:$16 sps:$4 sm:$0xff]   ;;  %s3184_s14 = scalar_lea.vmem %s3361_s0, %s2701_s11 }
  0x22   : > { %1553 = vmatpush1.bf16.msra.mxu1 %v2737_v7  ;;  %1513 = vmatprep.subr.bf16.mxu0 %v2738_v8  ;;  %v2746_v13 = vld [vmem:[#allocation2 + $0x284] ss:$16 sps:$4 sm:$0xff]   ;;  %v2749_v15 = vld [vmem:[#allocation2 + $0x280] ss:$16 sps:$4 sm:$0xff]   ;;  %v294_v46 = vld [vmem:[%s3184_s14 + $0x8] sm:$0xff] }
  0x23   : > { %1554 = vmatprep.subr.bf16.mxu1 %v2740_v9  ;;  %v2750_v16 = vld [vmem:[#allocation2 + $0x64] ss:$16 sps:$4 sm:$0xff]   ;;  %v2754_v18 = vld [vmem:[#allocation2 + $0x60] ss:$16 sps:$4 sm:$0xff]   ;;  %v3187_v49 = vpack.c.bf16 %v294_v46, %v294_v46  ;;  %v296_v50 = vld [vmem:[%s3184_s14 + $0x18] sm:$0xff] }
  0x24   : > { %v2752_v17 = vld [vmem:[#allocation2 + $0x264] ss:$16 sps:$4 sm:$0xff]   ;;  %v2755_v19 = vld [vmem:[#allocation2 + $0x260] ss:$16 sps:$4 sm:$0xff]   ;;  %v3190_v52 = vpack.c.bf16 %v296_v50, %v296_v50 }
  0x25   : > { %1514 = vmatpush1.bf16.msra.mxu0 %v2742_v10  ;;  %v2756_v20 = vld [vmem:[#allocation2 + $0x44] ss:$16 sps:$4 sm:$0xff]   ;;  %v2760_v22 = vld [vmem:[#allocation2 + $0x40] ss:$16 sps:$4 sm:$0xff]   ;;  %1541 = vmatprep.mubr.bf16.mxu0 %v3187_v49 }
  0x26   : > { %1555 = vmatpush1.bf16.msra.mxu1 %v2743_v11  ;;  %1515 = vmatprep.subr.bf16.mxu0 %v2744_v12  ;;  %v2758_v21 = vld [vmem:[#allocation2 + $0x244] ss:$16 sps:$4 sm:$0xff]   ;;  %v2761_v23 = vld [vmem:[#allocation2 + $0x240] ss:$16 sps:$4 sm:$0xff]  }
  0x27   : > { %1556 = vmatprep.subr.bf16.mxu1 %v2746_v13  ;;  %v2762_v24 = vld [vmem:[#allocation2 + $0x24] ss:$16 sps:$4 sm:$0xff]   ;;  %v2766_v26 = vld [vmem:[#allocation2 + $0x20] ss:$16 sps:$4 sm:$0xff]   ;;  %1582 = vmatprep.mubr.bf16.mxu1 %v3190_v52  ;;  %v2833_v13 = vld [vmem:[#allocation2 + $0xec] ss:$16 sps:$4 sm:$0xff]  }
  0x28   : > { %v2764_v25 = vld [vmem:[#allocation2 + $0x224] ss:$16 sps:$4 sm:$0xff]   ;;  %v2767_v27 = vld [vmem:[#allocation2 + $0x220] ss:$16 sps:$4 sm:$0xff]  }
  0x29   : > { %1516 = vmatpush1.bf16.msra.mxu0 %v2748_v14  ;;  %v2768_v28 = vld [vmem:[#allocation2 + $0x4] ss:$16 sps:$4 sm:$0xff]   ;;  %v2772_v30 = vld [vmem:[#allocation2] ss:$16 sps:$4 sm:$0xff]  }
  0x2a   : > { %1557 = vmatpush1.bf16.msra.mxu1 %v2749_v15  ;;  %1517 = vmatprep.subr.bf16.mxu0 %v2750_v16  ;;  %v2770_v29 = vld [vmem:[#allocation2 + $0x204] ss:$16 sps:$4 sm:$0xff]   ;;  %v2773_v31 = vld [vmem:[#allocation2 + $0x200] ss:$16 sps:$4 sm:$0xff]   ;;  %v3105_v16 = vmov 0  }
  0x2b   : > { %1558 = vmatprep.subr.bf16.mxu1 %v2752_v17  ;;  %v2774_v32 = vld [vmem:[#allocation2 + $0x1e4] ss:$16 sps:$4 sm:$0xff]   ;;  %v2778_v34 = vld [vmem:[#allocation2 + $0x1e0] ss:$16 sps:$4 sm:$0xff]  }
  0x2c   : > { %v2776_v33 = vld [vmem:[#allocation2 + $0x3e4] ss:$16 sps:$4 sm:$0xff]   ;;  %v2779_v35 = vld [vmem:[#allocation2 + $0x3e0] ss:$16 sps:$4 sm:$0xff]  }
  0x2d   : > { %1518 = vmatpush1.bf16.msra.mxu0 %v2754_v18  ;;  %v2780_v36 = vld [vmem:[#allocation2 + $0x1c4] ss:$16 sps:$4 sm:$0xff]   ;;  %v2784_v38 = vld [vmem:[#allocation2 + $0x1c0] ss:$16 sps:$4 sm:$0xff]   ;;  %v2831_v18 = vld [vmem:[#allocation2 + $0xe8] ss:$16 sps:$4 sm:$0xff]  }
  0x2e   : > { %1559 = vmatpush1.bf16.msra.mxu1 %v2755_v19  ;;  %1519 = vmatprep.subr.bf16.mxu0 %v2756_v20  ;;  %v2782_v37 = vld [vmem:[#allocation2 + $0x3c4] ss:$16 sps:$4 sm:$0xff]   ;;  %v2785_v39 = vld [vmem:[#allocation2 + $0x3c0] ss:$16 sps:$4 sm:$0xff]  }
  0x2f   : > { %1560 = vmatprep.subr.bf16.mxu1 %v2758_v21  ;;  %v2786_v40 = vld [vmem:[#allocation2 + $0x1a4] ss:$16 sps:$4 sm:$0xff]   ;;  %v2790_v42 = vld [vmem:[#allocation2 + $0x1a0] ss:$16 sps:$4 sm:$0xff]   ;;  %v2839_v21 = vld [vmem:[#allocation2 + $0xcc] ss:$16 sps:$4 sm:$0xff]  }
  0x30   : > { %v2788_v41 = vld [vmem:[#allocation2 + $0x3a4] ss:$16 sps:$4 sm:$0xff]   ;;  %v2791_v43 = vld [vmem:[#allocation2 + $0x3a0] ss:$16 sps:$4 sm:$0xff]  }
  0x31   : > { %1520 = vmatpush1.bf16.msra.mxu0 %v2760_v22  ;;  %v2792_v44 = vld [vmem:[#allocation2 + $0x184] ss:$16 sps:$4 sm:$0xff]   ;;  %v2796_v47 = vld [vmem:[#allocation2 + $0x180] ss:$16 sps:$4 sm:$0xff]  }
  0x32   : > { %1561 = vmatpush1.bf16.msra.mxu1 %v2761_v23  ;;  %1521 = vmatprep.subr.bf16.mxu0 %v2762_v24  ;;  %v2794_v45 = vld [vmem:[#allocation2 + $0x384] ss:$16 sps:$4 sm:$0xff]   ;;  %v2797_v48 = vld [vmem:[#allocation2 + $0x380] ss:$16 sps:$4 sm:$0xff]   ;;  %v2837_v23 = vld [vmem:[#allocation2 + $0xc8] ss:$16 sps:$4 sm:$0xff]  }
  0x33   : > { %1562 = vmatprep.subr.bf16.mxu1 %v2764_v25  ;;  %v2798_v51 = vld [vmem:[#allocation2 + $0x164] ss:$16 sps:$4 sm:$0xff]   ;;  %v2802_v54 = vld [vmem:[#allocation2 + $0x160] ss:$16 sps:$4 sm:$0xff]   ;;  %v2845_v25 = vld [vmem:[#allocation2 + $0xac] ss:$16 sps:$4 sm:$0xff]  }
  0x34   : > { %v2800_v53 = vld [vmem:[#allocation2 + $0x364] ss:$16 sps:$4 sm:$0xff]   ;;  %v2803_v55 = vld [vmem:[#allocation2 + $0x360] ss:$16 sps:$4 sm:$0xff]  }
  0x35   : > { %1522 = vmatpush1.bf16.msra.mxu0 %v2766_v26  ;;  %v2804_v56 = vld [vmem:[#allocation2 + $0x144] ss:$16 sps:$4 sm:$0xff]   ;;  %v2808_v58 = vld [vmem:[#allocation2 + $0x140] ss:$16 sps:$4 sm:$0xff]  }
  0x36   : > { %1563 = vmatpush1.bf16.msra.mxu1 %v2767_v27  ;;  %1523 = vmatprep.subr.bf16.mxu0 %v2768_v28  ;;  %v2806_v57 = vld [vmem:[#allocation2 + $0x344] ss:$16 sps:$4 sm:$0xff]   ;;  %v2809_v59 = vld [vmem:[#allocation2 + $0x340] ss:$16 sps:$4 sm:$0xff]   ;;  %v2843_v27 = vld [vmem:[#allocation2 + $0xa8] ss:$16 sps:$4 sm:$0xff]  }
  0x37   : > { %1564 = vmatprep.subr.bf16.mxu1 %v2770_v29  ;;  %v2810_v60 = vld [vmem:[#allocation2 + $0x124] ss:$16 sps:$4 sm:$0xff]   ;;  %v2814_v62 = vld [vmem:[#allocation2 + $0x120] ss:$16 sps:$4 sm:$0xff]   ;;  %v2851_v29 = vld [vmem:[#allocation2 + $0x8c] ss:$16 sps:$4 sm:$0xff]  }
  0x38   : > { %v2812_v61 = vld [vmem:[#allocation2 + $0x324] ss:$16 sps:$4 sm:$0xff]   ;;  %v2815_v63 = vld [vmem:[#allocation2 + $0x320] ss:$16 sps:$4 sm:$0xff]  }
  0x39   : > { %1524 = vmatpush1.bf16.msra.mxu0 %v2772_v30  ;;  %v2816_v0 = vld [vmem:[#allocation2 + $0x104] ss:$16 sps:$4 sm:$0xff]   ;;  %v2820_v2 = vld [vmem:[#allocation2 + $0x100] ss:$16 sps:$4 sm:$0xff]  }
  0x3a   : > { %1565 = vmatpush1.bf16.msra.mxu1 %v2773_v31  ;;  %1525 = vmatprep.subr.bf16.mxu0 %v2774_v32  ;;  %v2818_v1 = vld [vmem:[#allocation2 + $0x304] ss:$16 sps:$4 sm:$0xff]   ;;  %v2821_v3 = vld [vmem:[#allocation2 + $0x300] ss:$16 sps:$4 sm:$0xff]   ;;  %v2849_v31 = vld [vmem:[#allocation2 + $0x88] ss:$16 sps:$4 sm:$0xff]  }
  0x3b   : > { %1566 = vmatprep.subr.bf16.mxu1 %v2776_v33  ;;  %v293_v4 = vld [vmem:[%s3184_s14] sm:$0xff]  ;;  %v295_v5 = vld [vmem:[%s3184_s14 + $0x10] sm:$0xff]  ;;  %v2857_v33 = vld [vmem:[#allocation2 + $0x6c] ss:$16 sps:$4 sm:$0xff]  }
  0x3c   : > { %v2824_v6 = vld [vmem:[#allocation2 + $0x4e4] ss:$16 sps:$4 sm:$0xff]   ;;  %v3196_v8 = vpack.c.bf16 %v293_v4, %v293_v4  ;;  %v3198_v9 = vpack.c.bf16 %v295_v5, %v295_v5  ;;  %v2822_v10 = vld [vmem:[#allocation2 + $0x4e0] ss:$16 sps:$4 sm:$0xff]   ;;  %v2905_v4 = vld [vmem:[#allocation2 + $0x16c] ss:$16 sps:$4 sm:$0xff]  }
  0x3d   : > { %1526 = vmatpush2.bf16.msra.mxu0 %v2778_v34  ;;  %v2827_v7 = vld [vmem:[#allocation2 + $0x604] ss:$16 sps:$4 sm:$0xff]   ;;  %v2825_v11 = vld [vmem:[#allocation2 + $0x600] ss:$16 sps:$4 sm:$0xff]  }
  0x3e   : > { %1567 = vmatpush2.bf16.msra.mxu1 %v2779_v35  ;;  %1527 = vmatprep.subr.bf16.mxu0 %v2780_v36  ;;  %v2830_v12 = vld [vmem:[#allocation2 + $0x4c4] ss:$16 sps:$4 sm:$0xff]   ;;  %v2828_v14 = vld [vmem:[#allocation2 + $0x4c0] ss:$16 sps:$4 sm:$0xff]   ;;  %v298_v35 = vld [vmem:[%s3184_s14 + $0x28] sm:$0xff] }
  0x3f   : > { %1568 = vmatprep.subr.bf16.mxu1 %v2782_v37  ;;  %v299_v15 = vld [vmem:[%s3184_s14 + $0x30] sm:$0xff]  ;;  %v3210_v36 = vpack.c.bf16 %v298_v35, %v298_v35  ;;  %v2855_v37 = vld [vmem:[#allocation2 + $0x68] ss:$16 sps:$4 sm:$0xff]   ;;  %v2944_v35 = vld [vmem:[#allocation2 + $0x26c] ss:$16 sps:$4 sm:$0xff]  }
  0x40   : > { %v2836_v17 = vld [vmem:[#allocation2 + $0x4a4] ss:$16 sps:$4 sm:$0xff]   ;;  %v3204_v19 = vpack.c.bf16 %v299_v15, %v299_v15  ;;  %v2834_v20 = vld [vmem:[#allocation2 + $0x4a0] ss:$16 sps:$4 sm:$0xff]  }
  0x41   : > { %1528 = vmatpush2.bf16.msra.mxu0 %v2784_v38  ;;  %v2842_v22 = vld [vmem:[#allocation2 + $0x484] ss:$16 sps:$4 sm:$0xff]   ;;  %v2840_v24 = vld [vmem:[#allocation2 + $0x480] ss:$16 sps:$4 sm:$0xff]  }
  0x42   : > { %1569 = vmatpush2.bf16.msra.mxu1 %v2785_v39  ;;  %1529 = vmatprep.subr.bf16.mxu0 %v2786_v40  ;;  %v2848_v26 = vld [vmem:[#allocation2 + $0x464] ss:$16 sps:$4 sm:$0xff]   ;;  %v2846_v28 = vld [vmem:[#allocation2 + $0x460] ss:$16 sps:$4 sm:$0xff]   ;;  %v2863_v39 = vld [vmem:[#allocation2 + $0x4c] ss:$16 sps:$4 sm:$0xff]  }
  0x43   : > { %1570 = vmatprep.subr.bf16.mxu1 %v2788_v41  ;;  %v2854_v30 = vld [vmem:[#allocation2 + $0x444] ss:$16 sps:$4 sm:$0xff]   ;;  %v2852_v32 = vld [vmem:[#allocation2 + $0x440] ss:$16 sps:$4 sm:$0xff]   ;;  %v2861_v41 = vld [vmem:[#allocation2 + $0x48] ss:$16 sps:$4 sm:$0xff]  }
  0x44   : > { %v2860_v34 = vld [vmem:[#allocation2 + $0x424] ss:$16 sps:$4 sm:$0xff]   ;;  %v2858_v38 = vld [vmem:[#allocation2 + $0x420] ss:$16 sps:$4 sm:$0xff]  }
  0x45   : > { %1530 = vmatpush2.bf16.msra.mxu0 %v2790_v42  ;;  %v2866_v40 = vld [vmem:[#allocation2 + $0x404] ss:$16 sps:$4 sm:$0xff]   ;;  %v2864_v42 = vld [vmem:[#allocation2 + $0x400] ss:$16 sps:$4 sm:$0xff]  }
  0x46   : > { %1571 = vmatpush2.bf16.msra.mxu1 %v2791_v43  ;;  %1531 = vmatprep.subr.bf16.mxu0 %v2792_v44  ;;  %v2869_v43 = vld [vmem:[#allocation2 + $0x2c] ss:$16 sps:$4 sm:$0xff]   ;;  %v2872_v44 = vld [vmem:[#allocation2 + $0x5e4] ss:$16 sps:$4 sm:$0xff]   ;;  %v2870_v46 = vld [vmem:[#allocation2 + $0x5e0] ss:$16 sps:$4 sm:$0xff]  }
  0x47   : > { %1572 = vmatprep.subr.bf16.mxu1 %v2794_v45  ;;  %v2867_v45 = vld [vmem:[#allocation2 + $0x28] ss:$16 sps:$4 sm:$0xff]   ;;  %v2876_v50 = vld [vmem:[#allocation2 + $0x5c0] ss:$16 sps:$4 sm:$0xff]   ;;  %v2908_v5 = vld [vmem:[#allocation2 + $0x524] ss:$16 sps:$4 sm:$0xff]  }
  0x48   : > { %v297_v15 = vld [vmem:[%s3184_s14 + $0x20] sm:$0xff] }
  0x49   : > { %1532 = vmatpush2.bf16.msra.mxu0 %v2796_v47  ;;  %v2875_v47 = vld [vmem:[#allocation2 + $0xc] ss:$16 sps:$4 sm:$0xff]  }
  0x4a   : > { %1573 = vmatpush2.bf16.msra.mxu1 %v2797_v48  ;;  %1533 = vmatprep.subr.bf16.mxu0 %v2798_v51  ;;  %v2878_v48 = vld [vmem:[#allocation2 + $0x5c4] ss:$16 sps:$4 sm:$0xff]   ;;  %v2881_v51 = vld [vmem:[#allocation2 + $0x1ec] ss:$16 sps:$4 sm:$0xff]  }
  0x4b   : > { %1574 = vmatprep.subr.bf16.mxu1 %v2800_v53  ;;  %v2884_v53 = vld [vmem:[#allocation2 + $0x5a4] ss:$16 sps:$4 sm:$0xff]  }
  0x4d   : > { %1534 = vmatpush2.bf16.msra.mxu0 %v2802_v54  ;;  %v2879_v54 = vld [vmem:[#allocation2 + $0x1e8] ss:$16 sps:$4 sm:$0xff]  }
  0x4e   : > { %1575 = vmatpush2.bf16.msra.mxu1 %v2803_v55  ;;  %1535 = vmatprep.subr.bf16.mxu0 %v2804_v56  ;;  %v2882_v55 = vld [vmem:[#allocation2 + $0x5a0] ss:$16 sps:$4 sm:$0xff]   ;;  %v2887_v56 = vld [vmem:[#allocation2 + $0x1cc] ss:$16 sps:$4 sm:$0xff]  }
  0x4f   : > { %1576 = vmatprep.subr.bf16.mxu1 %v2806_v57  ;;  %v2890_v57 = vld [vmem:[#allocation2 + $0x584] ss:$16 sps:$4 sm:$0xff]  }
  0x51   : > { %1536 = vmatpush2.bf16.msra.mxu0 %v2808_v58  ;;  %v2885_v58 = vld [vmem:[#allocation2 + $0x1c8] ss:$16 sps:$4 sm:$0xff]  }
  0x52   : > { %1577 = vmatpush2.bf16.msra.mxu1 %v2809_v59  ;;  %1537 = vmatprep.subr.bf16.mxu0 %v2810_v60  ;;  %v2888_v59 = vld [vmem:[#allocation2 + $0x580] ss:$16 sps:$4 sm:$0xff]   ;;  %v2893_v60 = vld [vmem:[#allocation2 + $0x1ac] ss:$16 sps:$4 sm:$0xff]  }
  0x53   : > { %1578 = vmatprep.subr.bf16.mxu1 %v2812_v61  ;;  %v2896_v61 = vld [vmem:[#allocation2 + $0x564] ss:$16 sps:$4 sm:$0xff]  }
  0x55   : > { %1538 = vmatpush2.bf16.msra.mxu0 %v2814_v62  ;;  %v2891_v62 = vld [vmem:[#allocation2 + $0x1a8] ss:$16 sps:$4 sm:$0xff]  }
  0x56   : > { %1579 = vmatpush2.bf16.msra.mxu1 %v2815_v63  ;;  %1539 = vmatprep.subr.bf16.mxu0 %v2816_v0  ;;  %v2894_v63 = vld [vmem:[#allocation2 + $0x560] ss:$16 sps:$4 sm:$0xff]   ;;  %v2899_v0 = vld [vmem:[#allocation2 + $0x18c] ss:$16 sps:$4 sm:$0xff]  }
  0x57   : > { %1580 = vmatprep.subr.bf16.mxu1 %v2818_v1  ;;  %v2902_v1 = vld [vmem:[#allocation2 + $0x544] ss:$16 sps:$4 sm:$0xff]  }
  0x59   : > { %1540 = vmatpush2.bf16.msra.mxu0 %v2820_v2  ;;  %v2897_v2 = vld [vmem:[#allocation2 + $0x188] ss:$16 sps:$4 sm:$0xff]  }
  0x5a   : > { %1581 = vmatpush2.bf16.msra.mxu1 %v2821_v3  ;;  %1591 = vmatprep.subr.bf16.mxu0 %v2824_v6  ;;  %v2900_v3 = vld [vmem:[#allocation2 + $0x540] ss:$16 sps:$4 sm:$0xff]   ;;  %v2903_v6 = vld [vmem:[#allocation2 + $0x168] ss:$16 sps:$4 sm:$0xff]  }
  0x5b   : > { %1646 = vmatprep.subr.bf16.mxu1 %v2827_v7  ;;  %v2906_v7 = vld [vmem:[#allocation2 + $0x520] ss:$16 sps:$4 sm:$0xff]  }
  0x5c   : > { %1542 = vmatmul.mubr.bf16.vlgmr.msra.gmra.mxu0 %v3196_v8 }
  0x5d   : > { %1583 = vmatmul.mubr.bf16.vlgmr.msra.gmra.mxu1 %v3198_v9  ;;  %1592 = vmatpush1.bf16.msra.mxu0 %v2822_v10  ;;  %v2911_v10 = vld [vmem:[#allocation2 + $0x14c] ss:$16 sps:$4 sm:$0xff]  }
  0x5e   : > { %1647 = vmatpush1.bf16.msra.mxu1 %v2825_v11  ;;  %1593 = vmatprep.subr.bf16.mxu0 %v2830_v12  ;;  %v2914_v11 = vld [vmem:[#allocation2 + $0x504] ss:$16 sps:$4 sm:$0xff]   ;;  %v2909_v12 = vld [vmem:[#allocation2 + $0x148] ss:$16 sps:$4 sm:$0xff]  }
  0x5f   : > { %1664 = vmatprep.mubr.bf16.mxu1 %v3105_v16  ;;  %1673 = vmatprep.subr.bf16.mxu1 %v2833_v13  ;;  %v2912_v13 = vld [vmem:[#allocation2 + $0x500] ss:$16 sps:$4 sm:$0xff]  }
  0x60   : > { %1623 = vmatprep.mubr.bf16.mxu0 %v3210_v36 }
  0x61   : > { %1594 = vmatpush1.bf16.msra.mxu0 %v2828_v14  ;;  %v2917_v14 = vld [vmem:[#allocation2 + $0x12c] ss:$16 sps:$4 sm:$0xff]  }
  0x62   : > { %1595 = vmatprep.subr.bf16.mxu0 %v2836_v17  ;;  %v2920_v17 = vld [vmem:[#allocation2 + $0x2ec] ss:$16 sps:$4 sm:$0xff]  }
  0x65   : > { %2582 = vmatmul.mubr.msk.bf16.vlgmr.msra.gmra.mxu1 %vm1505_vm0, %v3204_v19  ;;  %1596 = vmatpush1.bf16.msra.mxu0 %v2834_v20  ;;  %v3214_v20 = vpack.c.bf16 %v297_v15, %v297_v15  ;;  %v3007_v15 = vld [vmem:[#allocation2 + $0x54c] ss:$16 sps:$4 sm:$0xff]  }
  0x66   : > { %1674 = vmatpush1.bf16.msra.mxu1 %v2831_v18  ;;  %1597 = vmatprep.subr.bf16.mxu0 %v2842_v22  ;;  %v2915_v18 = vld [vmem:[#allocation2 + $0x128] ss:$16 sps:$4 sm:$0xff]   ;;  %v2923_v22 = vld [vmem:[#allocation2 + $0x10c] ss:$16 sps:$4 sm:$0xff]  }
  0x67   : > { %1675 = vmatprep.subr.bf16.mxu1 %v2839_v21  ;;  %1705 = vmatprep.mubr.bf16.mxu1 %v3187_v49  ;;  %v2873_v49 = vld [vmem:[#allocation2 + $0x8] ss:$16 sps:$4 sm:$0xff]  }
  0x68   : > { %v2918_v21 = vld [vmem:[#allocation2 + $0x2e8] ss:$16 sps:$4 sm:$0xff]  }
  0x69   : > { %1598 = vmatpush1.bf16.msra.mxu0 %v2840_v24  ;;  %v2921_v24 = vld [vmem:[#allocation2 + $0x108] ss:$16 sps:$4 sm:$0xff]  }
  0x6a   : > { %1676 = vmatpush1.bf16.msra.mxu1 %v2837_v23  ;;  %1599 = vmatprep.subr.bf16.mxu0 %v2848_v26  ;;  %v2926_v23 = vld [vmem:[#allocation2 + $0x2cc] ss:$16 sps:$4 sm:$0xff]  }
  0x6b   : > { %1677 = vmatprep.subr.bf16.mxu1 %v2845_v25  ;;  %v2924_v25 = vld [vmem:[#allocation2 + $0x2c8] ss:$16 sps:$4 sm:$0xff]   ;;  %v2929_v26 = vld [vmem:[#allocation2 + $0x4ec] ss:$16 sps:$4 sm:$0xff]  }
  0x6d   : > { %1600 = vmatpush1.bf16.msra.mxu0 %v2846_v28  ;;  %v2927_v28 = vld [vmem:[#allocation2 + $0x4e8] ss:$16 sps:$4 sm:$0xff]  }
  0x6e   : > { %1678 = vmatpush1.bf16.msra.mxu1 %v2843_v27  ;;  %1601 = vmatprep.subr.bf16.mxu0 %v2854_v30  ;;  %v2932_v27 = vld [vmem:[#allocation2 + $0x2ac] ss:$16 sps:$4 sm:$0xff]  }
  0x6f   : > { %1679 = vmatprep.subr.bf16.mxu1 %v2851_v29  ;;  %v2930_v29 = vld [vmem:[#allocation2 + $0x2a8] ss:$16 sps:$4 sm:$0xff]   ;;  %v2935_v30 = vld [vmem:[#allocation2 + $0x4cc] ss:$16 sps:$4 sm:$0xff]  }
  0x71   : > { %1602 = vmatpush1.bf16.msra.mxu0 %v2852_v32  ;;  %v2933_v32 = vld [vmem:[#allocation2 + $0x4c8] ss:$16 sps:$4 sm:$0xff]  }
  0x72   : > { %1680 = vmatpush1.bf16.msra.mxu1 %v2849_v31  ;;  %1603 = vmatprep.subr.bf16.mxu0 %v2860_v34  ;;  %v2938_v31 = vld [vmem:[#allocation2 + $0x28c] ss:$16 sps:$4 sm:$0xff]  }
  0x73   : > { %1681 = vmatprep.subr.bf16.mxu1 %v2857_v33  ;;  %v2936_v33 = vld [vmem:[#allocation2 + $0x288] ss:$16 sps:$4 sm:$0xff]   ;;  %v2941_v34 = vld [vmem:[#allocation2 + $0x4ac] ss:$16 sps:$4 sm:$0xff]  }
  0x75   : > { %1604 = vmatpush1.bf16.msra.mxu0 %v2858_v38  ;;  %v2942_v38 = vld [vmem:[#allocation2 + $0x268] ss:$16 sps:$4 sm:$0xff]  }
  0x76   : > { %1682 = vmatpush1.bf16.msra.mxu1 %v2855_v37  ;;  %1605 = vmatprep.subr.bf16.mxu0 %v2866_v40  ;;  %v2939_v37 = vld [vmem:[#allocation2 + $0x4a8] ss:$16 sps:$4 sm:$0xff]  }
  0x77   : > { %1683 = vmatprep.subr.bf16.mxu1 %v2863_v39  ;;  %v2950_v39 = vld [vmem:[#allocation2 + $0x24c] ss:$16 sps:$4 sm:$0xff]   ;;  %v2945_v40 = vld [vmem:[#allocation2 + $0x488] ss:$16 sps:$4 sm:$0xff]  }
  0x79   : > { %1606 = vmatpush1.bf16.msra.mxu0 %v2864_v42  ;;  %v2953_v42 = vld [vmem:[#allocation2 + $0x46c] ss:$16 sps:$4 sm:$0xff]  }
  0x7a   : > { %1684 = vmatpush1.bf16.msra.mxu1 %v2861_v41  ;;  %1607 = vmatprep.subr.bf16.mxu0 %v2872_v44  ;;  %v2948_v41 = vld [vmem:[#allocation2 + $0x248] ss:$16 sps:$4 sm:$0xff]  }
  0x7b   : > { %1685 = vmatprep.subr.bf16.mxu1 %v2869_v43  ;;  %v2951_v43 = vld [vmem:[#allocation2 + $0x468] ss:$16 sps:$4 sm:$0xff]  }
  0x7c   : > { %v2954_v44 = vld [vmem:[#allocation2 + $0x228] ss:$16 sps:$4 sm:$0xff]  }
  0x7d   : > { %1608 = vmatpush2.bf16.msra.mxu0 %v2870_v46  ;;  %v2962_v46 = vld [vmem:[#allocation2 + $0x20c] ss:$16 sps:$4 sm:$0xff]  }
  0x7e   : > { %1686 = vmatpush1.bf16.msra.mxu1 %v2867_v45  ;;  %1609 = vmatprep.subr.bf16.mxu0 %v2878_v48  ;;  %v2959_v45 = vld [vmem:[#allocation2 + $0x44c] ss:$16 sps:$4 sm:$0xff]  }
  0x7f   : > { %1687 = vmatprep.subr.bf16.mxu1 %v2875_v47  ;;  %v2960_v47 = vld [vmem:[#allocation2 + $0x208] ss:$16 sps:$4 sm:$0xff]   ;;  %v2965_v48 = vld [vmem:[#allocation2 + $0x42c] ss:$16 sps:$4 sm:$0xff]  }
  0x81   : > { %1610 = vmatpush2.bf16.msra.mxu0 %v2876_v50  ;;  %v2963_v50 = vld [vmem:[#allocation2 + $0x428] ss:$16 sps:$4 sm:$0xff]  }
  0x82   : > { %1688 = vmatpush1.bf16.msra.mxu1 %v2873_v49  ;;  %1611 = vmatprep.subr.bf16.mxu0 %v2884_v53  ;;  %v2968_v49 = vld [vmem:[#allocation2 + $0x3ec] ss:$16 sps:$4 sm:$0xff]  }
  0x83   : > { %1689 = vmatprep.subr.bf16.mxu1 %v2881_v51  ;;  %v2966_v51 = vld [vmem:[#allocation2 + $0x3e8] ss:$16 sps:$4 sm:$0xff]   ;;  %v2971_v53 = vld [vmem:[#allocation2 + $0x40c] ss:$16 sps:$4 sm:$0xff]  }
  0x85   : > { %1612 = vmatpush2.bf16.msra.mxu0 %v2882_v55  ;;  %v2969_v55 = vld [vmem:[#allocation2 + $0x408] ss:$16 sps:$4 sm:$0xff]  }
  0x86   : > { %1690 = vmatpush2.bf16.msra.mxu1 %v2879_v54  ;;  %1613 = vmatprep.subr.bf16.mxu0 %v2890_v57  ;;  %v2974_v54 = vld [vmem:[#allocation2 + $0x3cc] ss:$16 sps:$4 sm:$0xff]  }
  0x87   : > { %1691 = vmatprep.subr.bf16.mxu1 %v2887_v56  ;;  %v2972_v56 = vld [vmem:[#allocation2 + $0x3c8] ss:$16 sps:$4 sm:$0xff]   ;;  %v2977_v57 = vld [vmem:[#allocation2 + $0x5ec] ss:$16 sps:$4 sm:$0xff]  }
  0x89   : > { %1614 = vmatpush2.bf16.msra.mxu0 %v2888_v59  ;;  %v2975_v59 = vld [vmem:[#allocation2 + $0x5e8] ss:$16 sps:$4 sm:$0xff]  }
  0x8a   : > { %1692 = vmatpush2.bf16.msra.mxu1 %v2885_v58  ;;  %1615 = vmatprep.subr.bf16.mxu0 %v2896_v61  ;;  %v2980_v58 = vld [vmem:[#allocation2 + $0x3ac] ss:$16 sps:$4 sm:$0xff]  }
  0x8b   : > { %1693 = vmatprep.subr.bf16.mxu1 %v2893_v60  ;;  %v2978_v60 = vld [vmem:[#allocation2 + $0x3a8] ss:$16 sps:$4 sm:$0xff]   ;;  %v2983_v61 = vld [vmem:[#allocation2 + $0x5cc] ss:$16 sps:$4 sm:$0xff]  }
  0x8d   : > { %1616 = vmatpush2.bf16.msra.mxu0 %v2894_v63  ;;  %v2981_v63 = vld [vmem:[#allocation2 + $0x5c8] ss:$16 sps:$4 sm:$0xff]  }
  0x8e   : > { %1694 = vmatpush2.bf16.msra.mxu1 %v2891_v62  ;;  %1617 = vmatprep.subr.bf16.mxu0 %v2902_v1  ;;  %v2986_v62 = vld [vmem:[#allocation2 + $0x38c] ss:$16 sps:$4 sm:$0xff]  }
  0x8f   : > { %1695 = vmatprep.subr.bf16.mxu1 %v2899_v0  ;;  %v2984_v0 = vld [vmem:[#allocation2 + $0x388] ss:$16 sps:$4 sm:$0xff]   ;;  %v2989_v1 = vld [vmem:[#allocation2 + $0x5ac] ss:$16 sps:$4 sm:$0xff]  }
  0x91   : > { %1618 = vmatpush2.bf16.msra.mxu0 %v2900_v3  ;;  %v2987_v3 = vld [vmem:[#allocation2 + $0x5a8] ss:$16 sps:$4 sm:$0xff]  }
  0x92   : > { %1696 = vmatpush2.bf16.msra.mxu1 %v2897_v2  ;;  %1619 = vmatprep.subr.bf16.mxu0 %v2908_v5  ;;  %v2992_v2 = vld [vmem:[#allocation2 + $0x36c] ss:$16 sps:$4 sm:$0xff]  }
  0x93   : > { %1697 = vmatprep.subr.bf16.mxu1 %v2905_v4  ;;  %v2990_v4 = vld [vmem:[#allocation2 + $0x368] ss:$16 sps:$4 sm:$0xff]   ;;  %v2995_v5 = vld [vmem:[#allocation2 + $0x58c] ss:$16 sps:$4 sm:$0xff]  }
  0x95   : > { %1620 = vmatpush2.bf16.msra.mxu0 %v2906_v7  ;;  %v2993_v7 = vld [vmem:[#allocation2 + $0x588] ss:$16 sps:$4 sm:$0xff]  }
  0x96   : > { %1698 = vmatpush2.bf16.msra.mxu1 %v2903_v6  ;;  %1621 = vmatprep.subr.bf16.mxu0 %v2914_v11  ;;  %v2998_v6 = vld [vmem:[#allocation2 + $0x34c] ss:$16 sps:$4 sm:$0xff]  }
  0x97   : > { %1699 = vmatprep.subr.bf16.mxu1 %v2911_v10  ;;  %v2996_v10 = vld [vmem:[#allocation2 + $0x348] ss:$16 sps:$4 sm:$0xff]   ;;  %v3001_v11 = vld [vmem:[#allocation2 + $0x56c] ss:$16 sps:$4 sm:$0xff]  }
  0x99   : > { %1622 = vmatpush2.bf16.msra.mxu0 %v2912_v13  ;;  %v2999_v13 = vld [vmem:[#allocation2 + $0x568] ss:$16 sps:$4 sm:$0xff]  }
  0x9a   : > { %1700 = vmatpush2.bf16.msra.mxu1 %v2909_v12  ;;  %1714 = vmatprep.subr.bf16.mxu0 %v2920_v17  ;;  %v3004_v12 = vld [vmem:[#allocation2 + $0x32c] ss:$16 sps:$4 sm:$0xff]  }
  0x9b   : > { %1701 = vmatprep.subr.bf16.mxu1 %v2917_v14  ;;  %v3002_v14 = vld [vmem:[#allocation2 + $0x328] ss:$16 sps:$4 sm:$0xff]   ;;  %v3010_v17 = vld [vmem:[#allocation2 + $0x30c] ss:$16 sps:$4 sm:$0xff]  }
  0x9c   : > { %1624 = vmatmul.mubr.bf16.vlgmr.msra.gmra.mxu0 %v3214_v20 }
  0x9d   : > { %1715 = vmatpush1.bf16.msra.mxu0 %v2918_v21  ;;  %1746 = vmatprep.mubr.bf16.mxu0 %v3190_v52  ;;  %v2947_v52 = vld [vmem:[#allocation2 + $0x48c] ss:$16 sps:$4 sm:$0xff]   ;;  %v3008_v21 = vld [vmem:[#allocation2 + $0x308] ss:$16 sps:$4 sm:$0xff]  }
  0x9e   : > { %1702 = vmatpush2.bf16.msra.mxu1 %v2915_v18  ;;  %1716 = vmatprep.subr.bf16.mxu0 %v2926_v23  ;;  %v3005_v18 = vld [vmem:[#allocation2 + $0x548] ss:$16 sps:$4 sm:$0xff]  }
  0x9f   : > { %1703 = vmatprep.subr.bf16.mxu1 %v2923_v22  ;;  %v3013_v22 = vld [vmem:[#allocation2 + $0x52c] ss:$16 sps:$4 sm:$0xff]  }
  0xa0   : > { %v3020_v23 = vld [vmem:[%s3364_s3 + $0x78] sm:$0xff]  }
  0xa1   : > { %1717 = vmatpush1.bf16.msra.mxu0 %v2924_v25  ;;  %v3021_v25 = vld [vmem:[%s3364_s3 + $0x38] sm:$0xff]  }
  0xa2   : > { %1704 = vmatpush2.bf16.msra.mxu1 %v2921_v24  ;;  %1718 = vmatprep.subr.bf16.mxu0 %v2932_v27  ;;  %v3011_v24 = vld [vmem:[#allocation2 + $0x528] ss:$16 sps:$4 sm:$0xff]   ;;  %v3022_v27 = vld [vmem:[%s3364_s3 + $0x70] sm:$0xff]  }
  0xa3   : > { %1755 = vmatprep.subr.bf16.mxu1 %v2929_v26  ;;  %v3016_v26 = vld [vmem:[#allocation2 + $0x50c] ss:$16 sps:$4 sm:$0xff]  }
  0xa5   : > { %1706 = vmatmul.mubr.bf16.vlgmr.msra.gmra.mxu1 %v3196_v8  ;;  %1719 = vmatpush1.bf16.msra.mxu0 %v2930_v29  ;;  %v2956_v8 = vld [vmem:[#allocation2 + $0x22c] ss:$16 sps:$4 sm:$0xff]   ;;  %v3023_v29 = vld [vmem:[%s3364_s3 + $0x30] sm:$0xff]  }
  0xa6   : > { %1756 = vmatpush1.bf16.msra.mxu1 %v2927_v28  ;;  %1720 = vmatprep.subr.bf16.mxu0 %v2938_v31  ;;  %v3014_v28 = vld [vmem:[#allocation2 + $0x508] ss:$16 sps:$4 sm:$0xff]  }
  0xa7   : > { %1757 = vmatprep.subr.bf16.mxu1 %v2935_v30  ;;  %1787 = vmatprep.mubr.bf16.mxu1 %v3210_v36  ;;  %v2957_v36 = vld [vmem:[#allocation2 + $0x448] ss:$16 sps:$4 sm:$0xff]   ;;  %v3019_v30 = vld [vmem:[#allocation2 + $0x60c] ss:$16 sps:$4 sm:$0xff]  }
  0xa8   : > { %v3024_v31 = vld [vmem:[%s3364_s3 + $0x68] sm:$0xff]  }
  0xa9   : > { %1721 = vmatpush1.bf16.msra.mxu0 %v2936_v33  ;;  %v3026_v33 = vld [vmem:[%s3364_s3 + $0x60] sm:$0xff]  }
  0xaa   : > { %1758 = vmatpush1.bf16.msra.mxu1 %v2933_v32  ;;  %1722 = vmatprep.subr.bf16.mxu0 %v2944_v35  ;;  %v3017_v32 = vld [vmem:[#allocation2 + $0x608] ss:$16 sps:$4 sm:$0xff]  }
  0xab   : > { %1759 = vmatprep.subr.bf16.mxu1 %v2941_v34  ;;  %v3027_v34 = vld [vmem:[%s3364_s3 + $0x20] sm:$0xff]   ;;  %v3028_v35 = vld [vmem:[%s3364_s3 + $0x58] sm:$0xff]  }
  0xad   : > { %1723 = vmatpush1.bf16.msra.mxu0 %v2942_v38  ;;  %v3038_v38 = vld [vmem:[%s3364_s3 + $0xf0] sm:$0xff]  }
  0xae   : > { %1760 = vmatpush1.bf16.msra.mxu1 %v2939_v37  ;;  %1724 = vmatprep.subr.bf16.mxu0 %v2950_v39  ;;  %v3029_v37 = vld [vmem:[%s3364_s3 + $0x18] sm:$0xff]   ;;  %v3039_v39 = vld [vmem:[%s3364_s3 + $0xb0] sm:$0xff]  }
  0xaf   : > { %1761 = vmatprep.subr.bf16.mxu1 %v2947_v52  ;;  %v3030_v52 = vld [vmem:[%s3364_s3 + $0x50] sm:$0xff]  }
  0xb1   : > { %1725 = vmatpush1.bf16.msra.mxu0 %v2948_v41  ;;  %v3032_v41 = vld [vmem:[%s3364_s3 + $0x48] sm:$0xff]  }
  0xb2   : > { %1762 = vmatpush1.bf16.msra.mxu1 %v2945_v40  ;;  %1726 = vmatprep.subr.bf16.mxu0 %v2956_v8  ;;  %v3031_v40 = vld [vmem:[%s3364_s3 + $0x10] sm:$0xff]   ;;  %v3035_v8 = vld [vmem:[%s3364_s3] sm:$0xff]  }
  0xb3   : > { %1763 = vmatprep.subr.bf16.mxu1 %v2953_v42  ;;  %v3034_v42 = vld [vmem:[%s3364_s3 + $0x40] sm:$0xff]  }
  0xb5   : > { %1727 = vmatpush1.bf16.msra.mxu0 %v2954_v44 }
  0xb6   : > { %1764 = vmatpush1.bf16.msra.mxu1 %v2951_v43  ;;  %1728 = vmatprep.subr.bf16.mxu0 %v2962_v46  ;;  %v3041_v46 = vld [vmem:[%s3364_s3 + $0xa8] sm:$0xff]  }
  0xb7   : > { %1765 = vmatprep.subr.bf16.mxu1 %v2959_v45  ;;  %v3040_v45 = vld [vmem:[%s3364_s3 + $0xe8] sm:$0xff]  }
  0xb9   : > { %1729 = vmatpush1.bf16.msra.mxu0 %v2960_v47 }
  0xba   : > { %1766 = vmatpush1.bf16.msra.mxu1 %v2957_v36  ;;  %1730 = vmatprep.subr.bf16.mxu0 %v2968_v49  ;;  %v3043_v49 = vld [vmem:[%s3364_s3 + $0xa0] sm:$0xff]  }
  0xbb   : > { %1767 = vmatprep.subr.bf16.mxu1 %v2965_v48  ;;  %v3042_v48 = vld [vmem:[%s3364_s3 + $0xe0] sm:$0xff]  }
  0xbd   : > { %1731 = vmatpush2.bf16.msra.mxu0 %v2966_v51 }
  0xbe   : > { %1768 = vmatpush1.bf16.msra.mxu1 %v2963_v50  ;;  %1732 = vmatprep.subr.bf16.mxu0 %v2974_v54 }
  0xbf   : > { %1769 = vmatprep.subr.bf16.mxu1 %v2971_v53 }
  0xc1   : > { %1733 = vmatpush2.bf16.msra.mxu0 %v2972_v56  ;;  %v3044_v56 = vld [vmem:[%s3364_s3 + $0xd8] sm:$0xff]  }
  0xc2   : > { %1770 = vmatpush1.bf16.msra.mxu1 %v2969_v55  ;;  %1734 = vmatprep.subr.bf16.mxu0 %v2980_v58 }
  0xc3   : > { %1771 = vmatprep.subr.bf16.mxu1 %v2977_v57  ;;  %v3045_v57 = vld [vmem:[%s3364_s3 + $0x98] sm:$0xff]  }
  0xc5   : > { %1735 = vmatpush2.bf16.msra.mxu0 %v2978_v60  ;;  %v3046_v60 = vld [vmem:[%s3364_s3 + $0xd0] sm:$0xff]  }
  0xc6   : > { %1772 = vmatpush2.bf16.msra.mxu1 %v2975_v59  ;;  %1736 = vmatprep.subr.bf16.mxu0 %v2986_v62 }
  0xc7   : > { %1773 = vmatprep.subr.bf16.mxu1 %v2983_v61  ;;  %v3047_v61 = vld [vmem:[%s3364_s3 + $0x90] sm:$0xff]  }
  0xc9   : > { %1737 = vmatpush2.bf16.msra.mxu0 %v2984_v0  ;;  %v3049_v0 = vld [vmem:[%s3364_s3 + $0x88] sm:$0xff]  }
  0xca   : > { %1774 = vmatpush2.bf16.msra.mxu1 %v2981_v63  ;;  %1738 = vmatprep.subr.bf16.mxu0 %v2992_v2  ;;  %v3048_v63 = vld [vmem:[%s3364_s3 + $0xc8] sm:$0xff]   ;;  %v3051_v2 = vld [vmem:[%s3364_s3 + $0x80] sm:$0xff]  }
  0xcb   : > { %1775 = vmatprep.subr.bf16.mxu1 %v2989_v1  ;;  %v3050_v1 = vld [vmem:[%s3364_s3 + $0xc0] sm:$0xff]  }
  0xcd   : > { %1739 = vmatpush2.bf16.msra.mxu0 %v2990_v4 }
  0xce   : > { %1776 = vmatpush2.bf16.msra.mxu1 %v2987_v3  ;;  %1740 = vmatprep.subr.bf16.mxu0 %v2998_v6  ;;  %v505_v3 = vlaneseq  ;;  %v503_v6 = vld [vmem:[%s3363_s2] sm:$0xf] }
  0xcf   : > { %1777 = vmatprep.subr.bf16.mxu1 %v2995_v5 }
  0xd0   : > { %v506_v4 = vshrl.u32 %v505_v3, 7 }
  0xd1   : > { %1741 = vmatpush2.bf16.msra.mxu0 %v2996_v10 }
  0xd2   : > { %1778 = vmatpush2.bf16.msra.mxu1 %v2993_v7  ;;  %1742 = vmatprep.subr.bf16.mxu0 %v3004_v12  ;;  %v507_v5 = vsub.s32 0, %v506_v4  ;;  %v511_v7 = vsub.s32 1, %v506_v4 }
  0xd3   : > { %1779 = vmatprep.subr.bf16.mxu1 %v3001_v11 }
  0xd4   : > { %v508_v10 = vrot.slane %v503_v6, %v507_v5  ;;  %v512_v11 = vrot.slane %v503_v6, %v511_v7 }
  0xd5   : > { %1743 = vmatpush2.bf16.msra.mxu0 %v3002_v14 }
  0xd6   : > { %1780 = vmatpush2.bf16.msra.mxu1 %v2999_v13  ;;  %1744 = vmatprep.subr.bf16.mxu0 %v3010_v17 }
  0xd7   : > { %1781 = vmatprep.subr.bf16.mxu1 %v3007_v15 }
  0xd9   : > { %1745 = vmatpush2.bf16.msra.mxu0 %v3008_v21 }
  0xda   : > { %1782 = vmatpush2.bf16.msra.mxu1 %v3005_v18  ;;  %2628 = vmatprep.subr.bf16.mxu0 %v3020_v23 }
  0xdb   : > { %1783 = vmatprep.subr.bf16.mxu1 %v3013_v22 }
  0xdc   : > { %1747 = vmatmul.mubr.bf16.vlgmr.msra.gmra.mxu0 %v3198_v9  ;;  %v3025_v9 = vld [vmem:[%s3364_s3 + $0x28] sm:$0xff]  }
  0xdd   : > { %2629 = vmatpush3.bf16.msra.mxu0 %v3021_v25 }
  0xde   : > { %1784 = vmatpush2.bf16.msra.mxu1 %v3011_v24  ;;  %2630 = vmatprep.subr.bf16.mxu0 %v3022_v27 }
  0xdf   : > { %1785 = vmatprep.subr.bf16.mxu1 %v3016_v26 }
  0xe1   : > { %2631 = vmatpush3.bf16.msra.mxu0 %v3023_v29 }
  0xe2   : > { %1786 = vmatpush2.bf16.msra.mxu1 %v3014_v28  ;;  %2632 = vmatprep.subr.bf16.mxu0 %v3024_v31 }
  0xe3   : > { %1810 = vmatprep.subr.bf16.mxu1 %v3019_v30 }
  0xe5   : > { %1788 = vmatmul.mubr.bf16.vlgmr.msra.gmra.mxu1 %v3214_v20  ;;  %2633 = vmatpush3.bf16.msra.mxu0 %v3025_v9  ;;  %v3036_v20 = vld [vmem:[%s3364_s3 + $0xf8] sm:$0xff]  }
  0xe6   : > { %1811 = vmatpush1.bf16.msra.mxu1 %v3017_v32  ;;  %1828 = vmatprep.mubr.bf16.mxu1 %v3105_v16  ;;  %v3037_v16 = vld [vmem:[%s3364_s3 + $0xb8] sm:$0xff]  }
  0xe7   : > { %2634 = vmatprep.subr.bf16.mxu0 %v3026_v33  ;;  %2650 = vmatprep.subr.bf16.mxu1 %v3036_v20 }
  0xe9   : > { %2635 = vmatpush3.bf16.msra.mxu0 %v3027_v34 }
  0xea   : > { %2636 = vmatprep.subr.bf16.mxu0 %v3028_v35 }
  0xed   : > { %2583 = vmatmul.mubr.msk.bf16.vlgmr.msra.gmra.mxu1 %vm1505_vm0, %v3204_v19  ;;  %2637 = vmatpush3.bf16.msra.mxu0 %v3029_v37  ;;  %v3033_v19 = vld [vmem:[%s3364_s3 + $0x8] sm:$0xff]   ;;  %v515_v37 = vsub.s32 2, %v506_v4 }
  0xee   : > { %2651 = vmatpush3.bf16.msra.mxu1 %v3037_v16  ;;  %2638 = vmatprep.subr.bf16.mxu0 %v3030_v52  ;;  %v519_v16 = vsub.s32 3, %v506_v4 }
  0xef   : > { %2652 = vmatprep.subr.bf16.mxu1 %v3038_v38  ;;  %v516_v52 = vrot.slane %v503_v6, %v515_v37 }
  0xf1   : > { %2639 = vmatpush3.bf16.msra.mxu0 %v3031_v40  ;;  %v520_v40 = vrot.slane %v503_v6, %v519_v16 }
  0xf2   : > { %2653 = vmatpush3.bf16.msra.mxu1 %v3039_v39  ;;  %2640 = vmatprep.subr.bf16.mxu0 %v3032_v41 }
  0xf3   : > { %2654 = vmatprep.subr.bf16.mxu1 %v3040_v45 }
  0xf5   : > { %2641 = vmatpush3.bf16.msra.mxu0 %v3033_v19 }
  0xf6   : > { %2642 = vmatprep.subr.bf16.mxu0 %v3034_v42  ;;  %2655 = vmatpush3.bf16.msra.mxu1 %v3041_v46 }
  0xf7   : > { %2656 = vmatprep.subr.bf16.mxu1 %v3042_v48 }
  0xf9   : > { %2643 = vmatpush3.bf16.msra.mxu0 %v3035_v8 }
  0xfa   : > { %2657 = vmatpush3.bf16.msra.mxu1 %v3043_v49 }
  0xfb   : > { %2658 = vmatprep.subr.bf16.mxu1 %v3044_v56  ;;  %v3053_v56 = vld [vmem:[%s3366_s5 + $0x30] sm:$0xff]  }
  0xfe   : > { %2659 = vmatpush3.bf16.msra.mxu1 %v3045_v57 }
  0xff   : > { %2660 = vmatprep.subr.bf16.mxu1 %v3046_v60 }
 0x102   : > { %2661 = vmatpush3.bf16.msra.mxu1 %v3047_v61  ;;  %v3054_v61 = vld [vmem:[%s3366_s5 + $0x28] sm:$0xff]  }
 0x103   : > { %2662 = vmatprep.subr.bf16.mxu1 %v3048_v63  ;;  %v3056_v63 = vld [vmem:[%s3366_s5 + $0x18] sm:$0xff]  }
 0x106   : > { %2663 = vmatpush3.bf16.msra.mxu1 %v3049_v0  ;;  %v3057_v0 = vld [vmem:[%s3366_s5 + $0x10] sm:$0xff]  }
 0x107   : > { %2664 = vmatprep.subr.bf16.mxu1 %v3050_v1  ;;  %v3058_v1 = vld [vmem:[%s3366_s5 + $0x8] sm:$0xff]  }
 0x10a   : > { %2665 = vmatpush3.bf16.msra.mxu1 %v3051_v2  ;;  %v3059_v2 = vld [vmem:[%s3366_s5] sm:$0xff]  }
 0x11c   : > { %v1543_v43 = vpop.f32.mrf.mxu0 }
 0x11d   : > { %v1584_v44 = vpop.f32.mrf.mxu1  ;;  %v1544_v12 = vadd.f32 %v1543_v43, %v508_v10  ;;  %v2584_v10 = vld [vmem:[%s3365_s4] ss:$0 sm:$0xff] }
 0x11e   : > { %v1545_v36 = vpop.f32.mrf.mxu0 }
 0x11f   : > { %v1586_v47 = vpop.f32.mrf.mxu1  ;;  %v1546_v13 = vadd.f32 %v1545_v36, %v512_v11  ;;  %v1585_v14 = vadd.f32 %v1584_v44, %v1544_v12 }
 0x120   : > { %v1547_v51 = vpop.f32.mrf.mxu0 }
 0x121   : > { %v1588_v50 = vpop.f32.mrf.mxu1  ;;  %v1587_v17 = vadd.f32 %v1586_v47, %v1546_v13 }
 0x122   : > { %v1548_v54 = vpop.f32.mrf.mxu0  ;;  %v3052_v50 = vld [vmem:[%s3366_s5 + $0x38] sm:$0xff]  }
 0x123   : > { %v1589_v53 = vpop.f32.mrf.mxu1 }
 0x124   : > { %v3106_v53 = vmov 0.0  }
 0x125   : > { %v1666_v55 = vpop.f32.mrf.mxu1  ;;  %2681 = vmatprep.subr.bf16.mxu0 %v3106_v53 }
 0x127   : > { %v1668_v58 = vpop.f32.mrf.mxu1 }
 0x129   : > { %v1670_v59 = vpop.f32.mrf.mxu1 }
 0x12b   : > { %v1671_v62 = vpop.f32.mrf.mxu1 }
 0x12c   : > { %v3055_v62 = vld [vmem:[%s3366_s5 + $0x20] sm:$0xff]  }
 0x15c   : > { %v1625_v15 = vpop.f32.mrf.mxu0 }
 0x15d   : > { %v1626_v18 = vadd.f32 %v1625_v15, %v1585_v14 }
 0x15e   : > { %v1627_v21 = vpop.f32.mrf.mxu0 }
 0x15f   : > { %v1667_v22 = vadd.f32 %v1666_v55, %v1626_v18  ;;  %v1628_v23 = vadd.f32 %v1627_v21, %v1587_v17 }
 0x160   : > { %v1629_v24 = vpop.f32.mrf.mxu0 }
 0x161   : > { %v1669_v25 = vadd.f32 %v1668_v58, %v1628_v23  ;;  %v1837_v26 = vmax.f32 %v1667_v22, 0.0  ;;  %v2617_v23 = vld [vmem:[%s3367_s6] ss:$0 sm:$0xff] }
 0x162   : > { %v1630_v27 = vpop.f32.mrf.mxu0 }
 0x163   : > { %v1838_v28 = vmax.f32 %v1669_v25, 0.0  ;;  %v1841_v31 = vpack.c.bf16 %v1837_v26, %v1837_v26 }
 0x165   : > { %v1707_v29 = vpop.f32.mrf.mxu1  ;;  %v1842_v30 = vpack.c.bf16 %v1838_v28, %v1838_v28 }
 0x166   : > { %v1708_v19 = vadd.f32 %v1707_v29, %v516_v52 }
 0x167   : > { %v1709_v32 = vpop.f32.mrf.mxu1  ;;  %2140 = vmatprep.mubr.bf16.mxu0 %v1842_v30 }
 0x168   : > { %2141 = vmatmul.mubr.bf16.vlgmr.msra.gmra.mxu0 %v1841_v31  ;;  %v1710_v8 = vadd.f32 %v1709_v32, %v520_v40 }
 0x169   : > { %v1711_v9 = vpop.f32.mrf.mxu1  ;;  %2682 = vmatpush3.bf16.msra.mxu0 %v3052_v50  ;;  %2697 = vmatprep.mubr.msk.bf16.mxu0 %vm3107_vm1, %v3106_v53 }
 0x16a   : > { %2683 = vmatprep.subr.bf16.mxu0 %v3106_v53 }
 0x16b   : > { %v1712_v33 = vpop.f32.mrf.mxu1 }
 0x16d   : > { %2684 = vmatpush3.bf16.msra.mxu0 %v3053_v56 }
 0x16e   : > { %2685 = vmatprep.subr.bf16.mxu0 %v3106_v53 }
 0x171   : > { %2686 = vmatpush3.bf16.msra.mxu0 %v3054_v61 }
 0x172   : > { %2687 = vmatprep.subr.bf16.mxu0 %v3106_v53 }
 0x175   : > { %2688 = vmatpush3.bf16.msra.mxu0 %v3055_v62 }
 0x176   : > { %2689 = vmatprep.subr.bf16.mxu0 %v3106_v53 }
 0x179   : > { %2690 = vmatpush3.bf16.msra.mxu0 %v3056_v63 }
 0x17a   : > { %2691 = vmatprep.subr.bf16.mxu0 %v3106_v53 }
 0x17d   : > { %2692 = vmatpush3.bf16.msra.mxu0 %v3057_v0 }
 0x17e   : > { %2693 = vmatprep.subr.bf16.mxu0 %v3106_v53 }
 0x181   : > { %2694 = vmatpush3.bf16.msra.mxu0 %v3058_v1 }
 0x182   : > { %2695 = vmatprep.subr.bf16.mxu0 %v3106_v53 }
 0x185   : > { %2696 = vmatpush3.bf16.msra.mxu0 %v3059_v2 }
 0x19c   : > { %v1748_v34 = vpop.f32.mrf.mxu0 }
 0x19d   : > { %v1749_v43 = vadd.f32 %v1748_v34, %v1708_v19 }
 0x19e   : > { %v1750_v35 = vpop.f32.mrf.mxu0 }
 0x19f   : > { %v1751_v45 = vadd.f32 %v1750_v35, %v1710_v8 }
 0x1a0   : > { %v1752_v20 = vpop.f32.mrf.mxu0 }
 0x1a2   : > { %v1753_v38 = vpop.f32.mrf.mxu0 }
 0x1a5   : > { %v1789_v39 = vpop.f32.mrf.mxu1 }
 0x1a6   : > { %v1790_v46 = vadd.f32 %v1789_v39, %v1749_v43 }
 0x1a7   : > { %v1791_v41 = vpop.f32.mrf.mxu1 }
 0x1a8   : > { %v1792_v47 = vadd.f32 %v1791_v41, %v1751_v45 }
 0x1a9   : > { %v1793_v42 = vpop.f32.mrf.mxu1 }
 0x1ab   : > { %v1794_v44 = vpop.f32.mrf.mxu1 }
 0x1ad   : > { %v1830_v36 = vpop.f32.mrf.mxu1 }
 0x1ae   : > { %v1831_v48 = vadd.f32 %v1830_v36, %v1790_v46 }
 0x1af   : > { %v1832_v49 = vpop.f32.mrf.mxu1 }
 0x1b0   : > { %v1833_v51 = vadd.f32 %v1832_v49, %v1792_v47  ;;  %v1839_v54 = vmax.f32 %v1831_v48, 0.0 }
 0x1b1   : > { %v1834_v55 = vpop.f32.mrf.mxu1 }
 0x1b2   : > { %v1840_v57 = vmax.f32 %v1833_v51, 0.0  ;;  %v1843_v60 = vpack.c.bf16 %v1839_v54, %v1839_v54 }
 0x1b3   : > { %v1835_v58 = vpop.f32.mrf.mxu1 }
 0x1b4   : > { %v1844_v59 = vpack.c.bf16 %v1840_v57, %v1840_v57 }
 0x1b6   : > { %2180 = vmatprep.mubr.bf16.mxu1 %v1844_v59 }
 0x1b7   : > { %2181 = vmatmul.mubr.bf16.vlgmr.msra.gmra.mxu1 %v1843_v60 }
 0x228   : > { %v2644_v3 = vpop.f32.mrf.mxu0 }
 0x22a   : > { %v2645_v4 = vpop.f32.mrf.mxu0 }
 0x22b   : > { %v2646_v5 = vadd.f32 %v2645_v4, %v2644_v3 }
 0x22c   : > { %v2647_v6 = vpop.f32.mrf.mxu0 }
 0x22d   : > { %v2143_v13 = vadd.f32 %v2646_v5, %v2584_v10 }
 0x22e   : > { %v2648_v7 = vpop.f32.mrf.mxu0 }
 0x277   : > { %v2666_v11 = vpop.f32.mrf.mxu1 }
 0x279   : > { %v2667_v12 = vpop.f32.mrf.mxu1 }
 0x27a   : > { %v2668_v14 = vadd.f32 %v2667_v12, %v2666_v11 }
 0x27b   : > { %v2669_v15 = vpop.f32.mrf.mxu1 }
 0x27c   : > { %v2183_v17 = vadd.f32 %v2668_v14, %v2143_v13 }
 0x27d   : > { %v2670_v18 = vpop.f32.mrf.mxu1 }
 0x27e   : > { %v2188_v21 = vmax.f32 %v2183_v17, 0.0 }
 0x280   : > { %v2189_v22 = vpack.c.bf16 %v2188_v21, %v2188_v21 }
 0x282   : > { %2698 = vmatmul.mubr.bf16.vlgmr.msra.gmra.mxu0 %v2189_v22 }
 0x342   : > { %v2295_v24 = vpop.f32.mrf.mxu0 }
 0x343   : > { %v2296_v25 = vadd.f32 %v2617_v23, %v2295_v24 }
 0x344   : > { %v2699_v26 = vpop.f32.mrf.mxu0 }
 0x345   : > { %2301 = vmax.xlane.f32.xlu0 %v2296_v25 }
 0x346   : > { %v2298_v27 = vpop.f32.mrf.mxu0 }
 0x348   : > { %v2700_v28 = vpop.f32.mrf.mxu0 }
 0x3ce   : > { %v2302_v29 = vpop.xlane.xlu0 %2301 }
 0x3cf   : > { %v2303_v30 = vsub.f32 %v2296_v25, %v2302_v29 }
 0x3d1   : > { %v2304_v31 = vmul.f32 1.442695, %v2303_v30 }
 0x3d3   : > { %3060 = vpow2.f32 %v2304_v31 }
 0x3e0   : > { %v3061_v32 = vpop.eup %3060 }
 0x3e1   : > { %2306 = vadd.xlane.f32.xlu0 %v3061_v32 }
 0x46a   : > { %v2307_v9 = vpop.xlane.xlu0 %2306 }
 0x46b   : > { %3062 = vlog2.f32 %v2307_v9 }
 0x478   : > { %v3063_v33 = vpop.eup %3062 }
 0x479   : > { %v2309_v34 = vmul.f32 0.6931472, %v3063_v33 }
 0x47b   : > { %v2310_v35 = vsub.f32 %v2303_v30, %v2309_v34 }
 0x47d   : > { %2311 = vst [vmem:[%s291_s20] sm:$0xff] %v2310_v35 }
 0x47e PF: > { %s18_s24 = sadd.s32 1, %s3100_s24  }
 0x47f   : > { %p15_p1 = scmp.ge.s32.totalorder %s18_s24, 4  }
 0x481   :  { %17 = sbr.rel (!%p15_p1) target bundleno = 1 (0x1), region = 83 }
 0x486   :  { %2331 = vsyncpa [#allocation3], 1 }
 0x487   :  { %2333 = vsyncpa [#allocation3 + $0x1], 1 }

</bundles_post_ra>
